<compile_context>
chip_gen: v6e
topology: v6e:2x2x1
jax: 0.10.0
libtpu: 0.0.40
codegen_flags: <defaults>
</compile_context>

<pallas_src>
import functools
import math

import jax
import jax.numpy as jnp
from jax import lax
from jax.experimental import pallas as pl
from jax.experimental.pallas import tpu as pltpu

D_MODEL = 32
NUM_HEADS = 1
D_K = D_MODEL // NUM_HEADS
FFN_HIDDEN = 4 * D_MODEL
LN_EPS = 1e-5


# ----------------------------- Pallas kernel ------------------------------- #

def _layernorm(h, gamma, beta):
    mu = jnp.mean(h, axis=-1, keepdims=True)
    var = jnp.mean((h - mu) * (h - mu), axis=-1, keepdims=True)
    return (h - mu) * lax.rsqrt(var + LN_EPS) * gamma + beta


def _rgat_kernel(sizes_ref,                                  # SMEM [B, 2]: (num_nodes, num_edges)
                 x_ref, idx_ref, rel_ref,
                 wqkv_ref, bqkv_ref, wo_ref, bo_ref,
                 ln1_g_ref, ln1_b_ref,
                 w1_ref, b1_ref, w2_ref, b2_ref,
                 ln2_g_ref, ln2_b_ref,
                 out_ref, *, inv_sqrt_dk):
    b = pl.program_id(0)
    num_nodes = sizes_ref[b, 0]
    num_edges = sizes_ref[b, 1]

    x = x_ref[0]                                             # [N, D] f32
    n = x.shape[0]
    d = x.shape[1]

    # --- fused q/k/v projection: one lane-denser [N, 3D] matmul (bias only on q) ---
    qkv = jnp.dot(x, wqkv_ref[...], preferred_element_type=jnp.float32) + bqkv_ref[...]
    q = qkv[:, 0:d]
    k = qkv[:, d:2 * d]
    v = qkv[:, 2 * d:3 * d]

    # --- in-kernel gather / scatter one-hots built from packed index vectors ---
    idx = idx_ref[0]                                         # [E, 4] int32: src | dst | rel | pad
    e_cnt = idx.shape[0]
    src = idx[:, 0:1]                                        # [E, 1]
    dst = idx[:, 1:2]
    rel = idx[:, 2:3]

    node_iota = lax.broadcasted_iota(jnp.int32, (e_cnt, n), 1)
    gsrc = (src == node_iota).astype(jnp.float32)            # [E, N]
    gdst = (dst == node_iota).astype(jnp.float32)            # [E, N]
    rel_iota = lax.broadcasted_iota(jnp.int32, (e_cnt, rel_ref.shape[0]), 1)
    grel = (rel == rel_iota).astype(jnp.float32)             # [E, R]

    k_src = jnp.dot(gsrc, k, preferred_element_type=jnp.float32)              # [E, D]
    q_dst = jnp.dot(gdst, q, preferred_element_type=jnp.float32)              # [E, D]
    v_src = jnp.dot(gsrc, v, preferred_element_type=jnp.float32)              # [E, D]
    e_feat = jnp.dot(grel, rel_ref[...], preferred_element_type=jnp.float32)  # [E, D]

    edge_valid = lax.broadcasted_iota(jnp.int32, (e_cnt, 1), 0) < num_edges

    # src_sum_edge_mul_dst + scaled_exp; padded edges contribute nothing
    score = jnp.sum((k_src + e_feat) * q_dst, axis=-1, keepdims=True) * inv_sqrt_dk
    score = jnp.exp(jnp.clip(score, -10.0, 10.0))
    score = jnp.where(edge_valid, score, 0.0)                # [E, 1]
    msg = (v_src + e_feat) * score                           # [E, D]

    # fn.sum over incoming edges: contract the edge axis of the dst one-hot (lhs-transposed MXU)
    dnums = (((0,), (0,)), ((), ()))
    wv = lax.dot_general(gdst, msg, dnums, preferred_element_type=jnp.float32)    # [N, D]
    z = lax.dot_general(gdst, score, dnums, preferred_element_type=jnp.float32)   # [N, 1]
    # div_by_z, guarded so isolated / padded nodes give 0 instead of NaN
    o = wv * pl.reciprocal(jnp.maximum(z, 1e-6), approx=True)

    # affine_o + residual + LayerNorm
    proj = jnp.dot(o, wo_ref[...], preferred_element_type=jnp.float32) + bo_ref[...]
    h = _layernorm(x + proj, ln1_g_ref[...], ln1_b_ref[...])

    # FFN: Linear(d,4d) -> ReLU -> Linear(4d,d) -> residual -> LayerNorm
    # TODO(synk): FFN structure taken from the LGESQL repo (4x hidden); not given in the spec.
    ff = jnp.maximum(
        jnp.dot(h, w1_ref[...], preferred_element_type=jnp.float32) + b1_ref[...], 0.0)
    ff = jnp.dot(ff, w2_ref[...], preferred_element_type=jnp.float32) + b2_ref[...]
    y = _layernorm(h + ff, ln2_g_ref[...], ln2_b_ref[...])

    # fused write-back: only real graph nodes get the new representation
    node_valid = lax.broadcasted_iota(jnp.int32, (n, 1), 0) < num_nodes
    out_ref[0] = jnp.where(node_valid, y, x)


# ------------------------------ JAX wrapper --------------------------------- #

def rgat_tuning_forward(hidden_states, sizes, idx, relation_table, params):
    """RGAT_Tuning.forward: batched, padded, single fused Pallas kernel."""
    B, L, D = hidden_states.shape
    E = idx.shape[1]
    R = relation_table.shape[0]
    H = params["w1"].shape[1]

    in_specs = [
        pl.BlockSpec((1, L, D), lambda b, s: (b, 0, 0)),      # hidden_states (per-graph block)
        pl.BlockSpec((1, E, 4), lambda b, s: (b, 0, 0)),      # packed src|dst|rel indices
        pl.BlockSpec((R, D), lambda b, s: (0, 0)),            # relation embedding table
        pl.BlockSpec((D, 3 * D), lambda b, s: (0, 0)),        # w_qkv (fused)
        pl.BlockSpec((1, 3 * D), lambda b, s: (0, 0)),        # b_qkv (bias only on q part)
        pl.BlockSpec((D, D), lambda b, s: (0, 0)),            # wo
        pl.BlockSpec((1, D), lambda b, s: (0, 0)),            # bo
        pl.BlockSpec((1, D), lambda b, s: (0, 0)),            # ln1 gamma
        pl.BlockSpec((1, D), lambda b, s: (0, 0)),            # ln1 beta
        pl.BlockSpec((D, H), lambda b, s: (0, 0)),            # ffn w1
        pl.BlockSpec((1, H), lambda b, s: (0, 0)),            # ffn b1
        pl.BlockSpec((H, D), lambda b, s: (0, 0)),            # ffn w2
        pl.BlockSpec((1, D), lambda b, s: (0, 0)),            # ffn b2
        pl.BlockSpec((1, D), lambda b, s: (0, 0)),            # ln2 gamma
        pl.BlockSpec((1, D), lambda b, s: (0, 0)),            # ln2 beta
    ]

    flops = B * 2 * (L * D * 3 * D + 3 * E * L * D + E * R * D
                     + L * E * (D + 1) + L * D * D + 2 * L * D * H)
    bytes_accessed = 4 * (2 * B * L * D + 4 * B * E + R * D
                          + 3 * D * D + 3 * D + D * D + 6 * D + 2 * D * H + H)
    cost = pl.CostEstimate(flops=flops,
                           transcendentals=B * (E + 3 * L),
                           bytes_accessed=bytes_accessed)

    return pl.pallas_call(
        functools.partial(_rgat_kernel, inv_sqrt_dk=1.0 / math.sqrt(D_K)),
        out_shape=jax.ShapeDtypeStruct((B, L, D), jnp.float32),
        grid_spec=pltpu.PrefetchScalarGridSpec(
            num_scalar_prefetch=1,
            grid=(B,),
            in_specs=in_specs,
            out_specs=pl.BlockSpec((1, L, D), lambda b, s: (b, 0, 0)),
        ),
        compiler_params=pltpu.CompilerParams(dimension_semantics=("parallel",)),
        cost_estimate=cost,
    )(sizes, hidden_states, idx, relation_table,
      params["w_qkv"], params["b_qkv"], params["wo"], params["bo"],
      params["ln1_g"], params["ln1_b"],
      params["w1"], params["b1"], params["w2"], params["b2"],
      params["ln2_g"], params["ln2_b"])


# --------------------------- parameters & graphs ----------------------------- #

def init_params(key, d_model):
    ks = jax.random.split(key, 10)

    def u(k, shape, fan_in):
        bound = 1.0 / math.sqrt(fan_in)
        return jax.random.uniform(k, shape, jnp.float32, -bound, bound)

    wq = u(ks[0], (d_model, d_model), d_model)
    bq = u(ks[1], (1, d_model), d_model)
    wk = u(ks[2], (d_model, d_model), d_model)
    wv = u(ks[3], (d_model, d_model), d_model)
    return {
        # fused q|k|v projection: affine_q has a bias, affine_k / affine_v do not.
        "w_qkv": jnp.concatenate([wq, wk, wv], axis=1),
        "b_qkv": jnp.concatenate([bq, jnp.zeros((1, 2 * d_model), jnp.float32)], axis=1),
        "wo": u(ks[4], (d_model, d_model), d_model),
        "bo": u(ks[5], (1, d_model), d_model),
        "ln1_g": jnp.ones((1, d_model), jnp.float32),
        "ln1_b": jnp.zeros((1, d_model), jnp.float32),
        "w1": u(ks[6], (d_model, FFN_HIDDEN), d_model),
        "b1": u(ks[7], (1, FFN_HIDDEN), d_model),
        "w2": u(ks[8], (FFN_HIDDEN, d_model), FFN_HIDDEN),
        "b2": u(ks[9], (1, d_model), FFN_HIDDEN),
        "ln2_g": jnp.ones((1, d_model), jnp.float32),
        "ln2_b": jnp.zeros((1, d_model), jnp.float32),
    }


def make_graph(num_nodes, num_relations):
    """Ring graph + self loops so every node has >= 1 incoming edge."""
    base = jnp.arange(num_nodes, dtype=jnp.int32)
    src = jnp.concatenate([base, base])
    dst = jnp.concatenate([(base + 1) % num_nodes, base])
    edges = jnp.arange(2 * num_nodes, dtype=jnp.int32) % num_relations
    return {"num_nodes": num_nodes, "src": src, "dst": dst, "edges": edges}


def pack_graph_batch(graph_batch, max_edges):
    """Pad/stack per-graph index lists into [B, MAX_E, 4] int32 + [B, 2] sizes."""
    sizes, rows = [], []
    for g in graph_batch:
        ne = int(g["src"].shape[0])
        pad = max_edges - ne
        src = jnp.pad(g["src"], (0, pad))
        dst = jnp.pad(g["dst"], (0, pad))
        rel = jnp.pad(g["edges"], (0, pad))
        rows.append(jnp.stack([src, dst, rel, jnp.zeros_like(src)], axis=-1))
        sizes.append((int(g["num_nodes"]), ne))
    return jnp.asarray(sizes, dtype=jnp.int32), jnp.stack(rows).astype(jnp.int32)


# ---------------------------------- main ------------------------------------ #

if __name__ == "__main__":
    # TODO(synk): feat_dropout (p=0.2) is identity at inference; training-mode dropout not modeled.
    key = jax.random.PRNGKey(0)
    k_hid, k_rel, k_par = jax.random.split(key, 3)

    B, L, D = 2, 8, D_MODEL
    NUM_RELATIONS = 10
    MAX_EDGES = 16        # max 2*num_nodes over the batch, multiple of 8

    hidden_states = jax.random.normal(k_hid, (B, L, D), jnp.float32)
    relation_table = 0.02 * jax.random.normal(k_rel, (NUM_RELATIONS, D), jnp.float32)
    params = init_params(k_par, D)

    graph_batch = [make_graph(6, NUM_RELATIONS), make_graph(8, NUM_RELATIONS)]
    sizes, idx = pack_graph_batch(graph_batch, MAX_EDGES)

    fwd = jax.jit(rgat_tuning_forward)
    out = jax.block_until_ready(fwd(hidden_states, sizes, idx, relation_table, params))

    assert out.shape == (B, L, D)
    assert bool(jnp.all(jnp.isfinite(out)))
    # rows beyond each graph's num_nodes must pass through unchanged
    assert bool(jnp.allclose(out[0, 6:], hidden_states[0, 6:]))
    print("KERNEL_OK")
</pallas_src>

<mosaic_0001>
module attributes {stable_mosaic.version = 11 : i64} {
  func.func @_rgat_kernel(%arg0: i32, %arg1: memref<2x2xi32, #tpu.memory_space<smem>>, %arg2: memref<1x8x32xf32, #tpu.memory_space<vmem>>, %arg3: memref<1x16x4xi32, #tpu.memory_space<vmem>>, %arg4: memref<10x32xf32, #tpu.memory_space<vmem>>, %arg5: memref<32x96xf32, #tpu.memory_space<vmem>>, %arg6: memref<1x96xf32, #tpu.memory_space<vmem>>, %arg7: memref<32x32xf32, #tpu.memory_space<vmem>>, %arg8: memref<1x32xf32, #tpu.memory_space<vmem>>, %arg9: memref<1x32xf32, #tpu.memory_space<vmem>>, %arg10: memref<1x32xf32, #tpu.memory_space<vmem>>, %arg11: memref<32x128xf32, #tpu.memory_space<vmem>>, %arg12: memref<1x128xf32, #tpu.memory_space<vmem>>, %arg13: memref<128x32xf32, #tpu.memory_space<vmem>>, %arg14: memref<1x32xf32, #tpu.memory_space<vmem>>, %arg15: memref<1x32xf32, #tpu.memory_space<vmem>>, %arg16: memref<1x32xf32, #tpu.memory_space<vmem>>, %arg17: memref<1x8x32xf32, #tpu.memory_space<vmem>>) attributes {dimension_semantics = [#tpu.dimension_semantics<parallel>], iteration_bounds = array<i64: 2>, scalar_prefetch = 1 : i64, scratch_operands = 0 : i64, tpu.core_type = #tpu.core_type<tc>, window_params = [{transform_indices = @transform_0, window_bounds = array<i64: 1, 8, 32>}, {transform_indices = @transform_1, window_bounds = array<i64: 1, 16, 4>}, {pipeline_mode = #tpu.pipeline_mode<synchronous>, transform_indices = @transform_2, window_bounds = array<i64: 10, 32>}, {pipeline_mode = #tpu.pipeline_mode<synchronous>, transform_indices = @transform_3, window_bounds = array<i64: 32, 96>}, {pipeline_mode = #tpu.pipeline_mode<synchronous>, transform_indices = @transform_4, window_bounds = array<i64: 1, 96>}, {pipeline_mode = #tpu.pipeline_mode<synchronous>, transform_indices = @transform_5, window_bounds = array<i64: 32, 32>}, {pipeline_mode = #tpu.pipeline_mode<synchronous>, transform_indices = @transform_6, window_bounds = array<i64: 1, 32>}, {pipeline_mode = #tpu.pipeline_mode<synchronous>, transform_indices = @transform_7, window_bounds = array<i64: 1, 32>}, {pipeline_mode = #tpu.pipeline_mode<synchronous>, transform_indices = @transform_8, window_bounds = array<i64: 1, 32>}, {pipeline_mode = #tpu.pipeline_mode<synchronous>, transform_indices = @transform_9, window_bounds = array<i64: 32, 128>}, {pipeline_mode = #tpu.pipeline_mode<synchronous>, transform_indices = @transform_10, window_bounds = array<i64: 1, 128>}, {pipeline_mode = #tpu.pipeline_mode<synchronous>, transform_indices = @transform_11, window_bounds = array<i64: 128, 32>}, {pipeline_mode = #tpu.pipeline_mode<synchronous>, transform_indices = @transform_12, window_bounds = array<i64: 1, 32>}, {pipeline_mode = #tpu.pipeline_mode<synchronous>, transform_indices = @transform_13, window_bounds = array<i64: 1, 32>}, {pipeline_mode = #tpu.pipeline_mode<synchronous>, transform_indices = @transform_14, window_bounds = array<i64: 1, 32>}, {transform_indices = @transform_15, window_bounds = array<i64: 1, 8, 32>}]} {
    %0 = arith.index_cast %arg0 : i32 to index
    %c0 = arith.constant 0 : index
    %1 = memref.load %arg1[%0, %c0] : memref<2x2xi32, #tpu.memory_space<smem>>
    %2 = arith.index_cast %arg0 : i32 to index
    %c1 = arith.constant 1 : index
    %3 = memref.load %arg1[%2, %c1] : memref<2x2xi32, #tpu.memory_space<smem>>
    %c0_0 = arith.constant 0 : index
    %c0_1 = arith.constant 0 : index
    %c0_2 = arith.constant 0 : index
    %4 = vector.load %arg2[%c0_0, %c0_1, %c0_2] : memref<1x8x32xf32, #tpu.memory_space<vmem>>, vector<1x8x32xf32>
    %5 = vector.shape_cast %4 : vector<1x8x32xf32> to vector<8x32xf32>
    %c0_3 = arith.constant 0 : index
    %c0_4 = arith.constant 0 : index
    %6 = vector.load %arg5[%c0_3, %c0_4] : memref<32x96xf32, #tpu.memory_space<vmem>>, vector<32x96xf32>
    %cst = arith.constant dense<0.000000e+00> : vector<8x96xf32>
    %7 = tpu.matmul %5, %6, %cst {dimension_numbers = #tpu.dot_dimension_numbers<[1], [0], [0], [1], [0, 0, 1, 1], [], []>} : vector<8x32xf32>, vector<32x96xf32>, vector<8x96xf32> -> vector<8x96xf32>
    %c0_5 = arith.constant 0 : index
    %c0_6 = arith.constant 0 : index
    %8 = vector.load %arg6[%c0_5, %c0_6] : memref<1x96xf32, #tpu.memory_space<vmem>>, vector<1x96xf32>
    %9 = vector.broadcast %8 : vector<1x96xf32> to vector<8x96xf32>
    %10 = arith.addf %7, %9 : vector<8x96xf32>
    %11 = vector.extract_strided_slice %10 {offsets = [0, 0], sizes = [8, 32], strides = [1, 1]} : vector<8x96xf32> to vector<8x32xf32>
    %12 = vector.extract_strided_slice %10 {offsets = [0, 32], sizes = [8, 32], strides = [1, 1]} : vector<8x96xf32> to vector<8x32xf32>
    %13 = vector.extract_strided_slice %10 {offsets = [0, 64], sizes = [8, 32], strides = [1, 1]} : vector<8x96xf32> to vector<8x32xf32>
    %c0_7 = arith.constant 0 : index
    %c0_8 = arith.constant 0 : index
    %c0_9 = arith.constant 0 : index
    %14 = vector.load %arg3[%c0_7, %c0_8, %c0_9] : memref<1x16x4xi32, #tpu.memory_space<vmem>>, vector<1x16x4xi32>
    %15 = vector.shape_cast %14 : vector<1x16x4xi32> to vector<16x4xi32>
    %16 = vector.extract_strided_slice %15 {offsets = [0, 0], sizes = [16, 1], strides = [1, 1]} : vector<16x4xi32> to vector<16x1xi32>
    %17 = vector.extract_strided_slice %15 {offsets = [0, 1], sizes = [16, 1], strides = [1, 1]} : vector<16x4xi32> to vector<16x1xi32>
    %18 = vector.extract_strided_slice %15 {offsets = [0, 2], sizes = [16, 1], strides = [1, 1]} : vector<16x4xi32> to vector<16x1xi32>
    %19 = tpu.iota {dimensions = array<i32: 1>} : vector<16x8xi32>
    %20 = vector.broadcast %16 : vector<16x1xi32> to vector<16x8xi32>
    %21 = arith.cmpi eq, %20, %19 : vector<16x8xi32>
    %22 = arith.extui %21 : vector<16x8xi1> to vector<16x8xi32>
    %23 = arith.sitofp %22 : vector<16x8xi32> to vector<16x8xf32>
    %24 = vector.broadcast %17 : vector<16x1xi32> to vector<16x8xi32>
    %25 = arith.cmpi eq, %24, %19 : vector<16x8xi32>
    %26 = arith.extui %25 : vector<16x8xi1> to vector<16x8xi32>
    %27 = arith.sitofp %26 : vector<16x8xi32> to vector<16x8xf32>
    %28 = tpu.iota {dimensions = array<i32: 1>} : vector<16x10xi32>
    %29 = vector.broadcast %18 : vector<16x1xi32> to vector<16x10xi32>
    %30 = arith.cmpi eq, %29, %28 : vector<16x10xi32>
    %31 = arith.extui %30 : vector<16x10xi1> to vector<16x10xi32>
    %32 = arith.sitofp %31 : vector<16x10xi32> to vector<16x10xf32>
    %cst_10 = arith.constant dense<0.000000e+00> : vector<16x32xf32>
    %33 = tpu.matmul %23, %12, %cst_10 {dimension_numbers = #tpu.dot_dimension_numbers<[1], [0], [0], [1], [0, 0, 1, 1], [], []>} : vector<16x8xf32>, vector<8x32xf32>, vector<16x32xf32> -> vector<16x32xf32>
    %cst_11 = arith.constant dense<0.000000e+00> : vector<16x32xf32>
    %34 = tpu.matmul %27, %11, %cst_11 {dimension_numbers = #tpu.dot_dimension_numbers<[1], [0], [0], [1], [0, 0, 1, 1], [], []>} : vector<16x8xf32>, vector<8x32xf32>, vector<16x32xf32> -> vector<16x32xf32>
    %cst_12 = arith.constant dense<0.000000e+00> : vector<16x32xf32>
    %35 = tpu.matmul %23, %13, %cst_12 {dimension_numbers = #tpu.dot_dimension_numbers<[1], [0], [0], [1], [0, 0, 1, 1], [], []>} : vector<16x8xf32>, vector<8x32xf32>, vector<16x32xf32> -> vector<16x32xf32>
    %c0_13 = arith.constant 0 : index
    %c0_14 = arith.constant 0 : index
    %36 = vector.load %arg4[%c0_13, %c0_14] : memref<10x32xf32, #tpu.memory_space<vmem>>, vector<10x32xf32>
    %cst_15 = arith.constant dense<0.000000e+00> : vector<16x32xf32>
    %37 = tpu.matmul %32, %36, %cst_15 {dimension_numbers = #tpu.dot_dimension_numbers<[1], [0], [0], [1], [0, 0, 1, 1], [], []>} : vector<16x10xf32>, vector<10x32xf32>, vector<16x32xf32> -> vector<16x32xf32>
    %38 = tpu.iota {dimensions = array<i32: 0>} : vector<16x1xi32>
    %39 = vector.broadcast %3 : i32 to vector<16x1xi32>
    %40 = arith.cmpi slt, %38, %39 : vector<16x1xi32>
    %41 = arith.addf %33, %37 : vector<16x32xf32>
    %42 = arith.mulf %41, %34 : vector<16x32xf32>
    %cst_16 = arith.constant dense<0.000000e+00> : vector<16xf32>
    %43 = vector.multi_reduction <add>, %42, %cst_16 [1] : vector<16x32xf32> to vector<16xf32>
    %44 = vector.shape_cast %43 : vector<16xf32> to vector<16x1xf32>
    %cst_17 = arith.constant 0.176776692 : f32
    %45 = vector.broadcast %cst_17 : f32 to vector<16x1xf32>
    %46 = arith.mulf %44, %45 : vector<16x1xf32>
    %cst_18 = arith.constant -1.000000e+01 : f32
    %cst_19 = arith.constant 1.000000e+01 : f32
    %47 = vector.broadcast %cst_18 : f32 to vector<16x1xf32>
    %48 = arith.maximumf %47, %46 : vector<16x1xf32>
    %49 = vector.broadcast %cst_19 : f32 to vector<16x1xf32>
    %50 = arith.minimumf %49, %48 : vector<16x1xf32>
    %51 = math.exp %50 : vector<16x1xf32>
    %cst_20 = arith.constant 0.000000e+00 : f32
    %52 = vector.broadcast %cst_20 : f32 to vector<16x1xf32>
    %53 = arith.select %40, %51, %52 : vector<16x1xi1>, vector<16x1xf32>
    %54 = arith.addf %35, %37 : vector<16x32xf32>
    %55 = vector.broadcast %53 : vector<16x1xf32> to vector<16x32xf32>
    %56 = arith.mulf %54, %55 : vector<16x32xf32>
    %cst_21 = arith.constant dense<0.000000e+00> : vector<8x32xf32>
    %57 = tpu.matmul %27, %56, %cst_21 {dimension_numbers = #tpu.dot_dimension_numbers<[0], [0], [1], [1], [0, 1, 1, 1], [], []>} : vector<16x8xf32>, vector<16x32xf32>, vector<8x32xf32> -> vector<8x32xf32>
    %cst_22 = arith.constant dense<0.000000e+00> : vector<8x1xf32>
    %58 = tpu.matmul %27, %53, %cst_22 {dimension_numbers = #tpu.dot_dimension_numbers<[0], [0], [1], [1], [0, 1, 1, 1], [], []>} : vector<16x8xf32>, vector<16x1xf32>, vector<8x1xf32> -> vector<8x1xf32>
    %cst_23 = arith.constant 9.99999997E-7 : f32
    %59 = vector.broadcast %cst_23 : f32 to vector<8x1xf32>
    %60 = arith.maximumf %58, %59 : vector<8x1xf32>
    %61 = tpu.reciprocal %60 {approx = true} : vector<8x1xf32> -> vector<8x1xf32>
    %62 = vector.broadcast %61 : vector<8x1xf32> to vector<8x32xf32>
    %63 = arith.mulf %57, %62 : vector<8x32xf32>
    %c0_24 = arith.constant 0 : index
    %c0_25 = arith.constant 0 : index
    %64 = vector.load %arg7[%c0_24, %c0_25] : memref<32x32xf32, #tpu.memory_space<vmem>>, vector<32x32xf32>
    %cst_26 = arith.constant dense<0.000000e+00> : vector<8x32xf32>
    %65 = tpu.matmul %63, %64, %cst_26 {dimension_numbers = #tpu.dot_dimension_numbers<[1], [0], [0], [1], [0, 0, 1, 1], [], []>} : vector<8x32xf32>, vector<32x32xf32>, vector<8x32xf32> -> vector<8x32xf32>
    %c0_27 = arith.constant 0 : index
    %c0_28 = arith.constant 0 : index
    %66 = vector.load %arg8[%c0_27, %c0_28] : memref<1x32xf32, #tpu.memory_space<vmem>>, vector<1x32xf32>
    %67 = vector.broadcast %66 : vector<1x32xf32> to vector<8x32xf32>
    %68 = arith.addf %65, %67 : vector<8x32xf32>
    %69 = arith.addf %5, %68 : vector<8x32xf32>
    %c0_29 = arith.constant 0 : index
    %c0_30 = arith.constant 0 : index
    %70 = vector.load %arg9[%c0_29, %c0_30] : memref<1x32xf32, #tpu.memory_space<vmem>>, vector<1x32xf32>
    %c0_31 = arith.constant 0 : index
    %c0_32 = arith.constant 0 : index
    %71 = vector.load %arg10[%c0_31, %c0_32] : memref<1x32xf32, #tpu.memory_space<vmem>>, vector<1x32xf32>
    %cst_33 = arith.constant dense<0.000000e+00> : vector<8xf32>
    %72 = vector.multi_reduction <add>, %69, %cst_33 [1] : vector<8x32xf32> to vector<8xf32>
    %73 = vector.shape_cast %72 : vector<8xf32> to vector<8x1xf32>
    %cst_34 = arith.constant 3.200000e+01 : f32
    %74 = vector.broadcast %cst_34 : f32 to vector<8x1xf32>
    %75 = arith.divf %73, %74 : vector<8x1xf32>
    %76 = vector.broadcast %75 : vector<8x1xf32> to vector<8x32xf32>
    %77 = arith.subf %69, %76 : vector<8x32xf32>
    %78 = vector.broadcast %75 : vector<8x1xf32> to vector<8x32xf32>
    %79 = arith.subf %69, %78 : vector<8x32xf32>
    %80 = arith.mulf %77, %79 : vector<8x32xf32>
    %cst_35 = arith.constant dense<0.000000e+00> : vector<8xf32>
    %81 = vector.multi_reduction <add>, %80, %cst_35 [1] : vector<8x32xf32> to vector<8xf32>
    %82 = vector.shape_cast %81 : vector<8xf32> to vector<8x1xf32>
    %cst_36 = arith.constant 3.200000e+01 : f32
    %83 = vector.broadcast %cst_36 : f32 to vector<8x1xf32>
    %84 = arith.divf %82, %83 : vector<8x1xf32>
    %85 = vector.broadcast %75 : vector<8x1xf32> to vector<8x32xf32>
    %86 = arith.subf %69, %85 : vector<8x32xf32>
    %cst_37 = arith.constant 9.99999974E-6 : f32
    %87 = vector.broadcast %cst_37 : f32 to vector<8x1xf32>
    %88 = arith.addf %84, %87 : vector<8x1xf32>
    %89 = math.rsqrt %88 : vector<8x1xf32>
    %90 = vector.broadcast %89 : vector<8x1xf32> to vector<8x32xf32>
    %91 = arith.mulf %86, %90 : vector<8x32xf32>
    %92 = vector.broadcast %70 : vector<1x32xf32> to vector<8x32xf32>
    %93 = arith.mulf %91, %92 : vector<8x32xf32>
    %94 = vector.broadcast %71 : vector<1x32xf32> to vector<8x32xf32>
    %95 = arith.addf %93, %94 : vector<8x32xf32>
    %c0_38 = arith.constant 0 : index
    %c0_39 = arith.constant 0 : index
    %96 = vector.load %arg11[%c0_38, %c0_39] : memref<32x128xf32, #tpu.memory_space<vmem>>, vector<32x128xf32>
    %cst_40 = arith.constant dense<0.000000e+00> : vector<8x128xf32>
    %97 = tpu.matmul %95, %96, %cst_40 {dimension_numbers = #tpu.dot_dimension_numbers<[1], [0], [0], [1], [0, 0, 1, 1], [], []>} : vector<8x32xf32>, vector<32x128xf32>, vector<8x128xf32> -> vector<8x128xf32>
    %c0_41 = arith.constant 0 : index
    %c0_42 = arith.constant 0 : index
    %98 = vector.load %arg12[%c0_41, %c0_42] : memref<1x128xf32, #tpu.memory_space<vmem>>, vector<1x128xf32>
    %99 = vector.broadcast %98 : vector<1x128xf32> to vector<8x128xf32>
    %100 = arith.addf %97, %99 : vector<8x128xf32>
    %cst_43 = arith.constant 0.000000e+00 : f32
    %101 = vector.broadcast %cst_43 : f32 to vector<8x128xf32>
    %102 = arith.maximumf %100, %101 : vector<8x128xf32>
    %c0_44 = arith.constant 0 : index
    %c0_45 = arith.constant 0 : index
    %103 = vector.load %arg13[%c0_44, %c0_45] : memref<128x32xf32, #tpu.memory_space<vmem>>, vector<128x32xf32>
    %cst_46 = arith.constant dense<0.000000e+00> : vector<8x32xf32>
    %104 = tpu.matmul %102, %103, %cst_46 {dimension_numbers = #tpu.dot_dimension_numbers<[1], [0], [0], [1], [0, 0, 1, 1], [], []>} : vector<8x128xf32>, vector<128x32xf32>, vector<8x32xf32> -> vector<8x32xf32>
    %c0_47 = arith.constant 0 : index
    %c0_48 = arith.constant 0 : index
    %105 = vector.load %arg14[%c0_47, %c0_48] : memref<1x32xf32, #tpu.memory_space<vmem>>, vector<1x32xf32>
    %106 = vector.broadcast %105 : vector<1x32xf32> to vector<8x32xf32>
    %107 = arith.addf %104, %106 : vector<8x32xf32>
    %108 = arith.addf %95, %107 : vector<8x32xf32>
    %c0_49 = arith.constant 0 : index
    %c0_50 = arith.constant 0 : index
    %109 = vector.load %arg15[%c0_49, %c0_50] : memref<1x32xf32, #tpu.memory_space<vmem>>, vector<1x32xf32>
    %c0_51 = arith.constant 0 : index
    %c0_52 = arith.constant 0 : index
    %110 = vector.load %arg16[%c0_51, %c0_52] : memref<1x32xf32, #tpu.memory_space<vmem>>, vector<1x32xf32>
    %cst_53 = arith.constant dense<0.000000e+00> : vector<8xf32>
    %111 = vector.multi_reduction <add>, %108, %cst_53 [1] : vector<8x32xf32> to vector<8xf32>
    %112 = vector.shape_cast %111 : vector<8xf32> to vector<8x1xf32>
    %cst_54 = arith.constant 3.200000e+01 : f32
    %113 = vector.broadcast %cst_54 : f32 to vector<8x1xf32>
    %114 = arith.divf %112, %113 : vector<8x1xf32>
    %115 = vector.broadcast %114 : vector<8x1xf32> to vector<8x32xf32>
    %116 = arith.subf %108, %115 : vector<8x32xf32>
    %117 = vector.broadcast %114 : vector<8x1xf32> to vector<8x32xf32>
    %118 = arith.subf %108, %117 : vector<8x32xf32>
    %119 = arith.mulf %116, %118 : vector<8x32xf32>
    %cst_55 = arith.constant dense<0.000000e+00> : vector<8xf32>
    %120 = vector.multi_reduction <add>, %119, %cst_55 [1] : vector<8x32xf32> to vector<8xf32>
    %121 = vector.shape_cast %120 : vector<8xf32> to vector<8x1xf32>
    %cst_56 = arith.constant 3.200000e+01 : f32
    %122 = vector.broadcast %cst_56 : f32 to vector<8x1xf32>
    %123 = arith.divf %121, %122 : vector<8x1xf32>
    %124 = vector.broadcast %114 : vector<8x1xf32> to vector<8x32xf32>
    %125 = arith.subf %108, %124 : vector<8x32xf32>
    %cst_57 = arith.constant 9.99999974E-6 : f32
    %126 = vector.broadcast %cst_57 : f32 to vector<8x1xf32>
    %127 = arith.addf %123, %126 : vector<8x1xf32>
    %128 = math.rsqrt %127 : vector<8x1xf32>
    %129 = vector.broadcast %128 : vector<8x1xf32> to vector<8x32xf32>
    %130 = arith.mulf %125, %129 : vector<8x32xf32>
    %131 = vector.broadcast %109 : vector<1x32xf32> to vector<8x32xf32>
    %132 = arith.mulf %130, %131 : vector<8x32xf32>
    %133 = vector.broadcast %110 : vector<1x32xf32> to vector<8x32xf32>
    %134 = arith.addf %132, %133 : vector<8x32xf32>
    %135 = tpu.iota {dimensions = array<i32: 0>} : vector<8x1xi32>
    %136 = vector.broadcast %1 : i32 to vector<8x1xi32>
    %137 = arith.cmpi slt, %135, %136 : vector<8x1xi32>
    %138 = vector.shape_cast %137 : vector<8x1xi1> to vector<8x1xi1>
    %139 = vector.broadcast %138 : vector<8x1xi1> to vector<8x32xi1>
    %140 = arith.select %139, %134, %5 : vector<8x32xi1>, vector<8x32xf32>
    %c0_58 = arith.constant 0 : index
    %c0_59 = arith.constant 0 : index
    %c0_60 = arith.constant 0 : index
    %141 = vector.load %arg17[%c0_58, %c0_59, %c0_60] : memref<1x8x32xf32, #tpu.memory_space<vmem>>, vector<1x8x32xf32>
    %142 = vector.shape_cast %141 : vector<1x8x32xf32> to vector<8x32xf32>
    %143 = vector.shape_cast %140 : vector<8x32xf32> to vector<1x8x32xf32>
    tpu.vector_store %arg17[%c0_58, %c0_59, %c0_60], %143 {strides = array<i32>} : memref<1x8x32xf32, #tpu.memory_space<vmem>>, vector<1x8x32xf32>,
    return
  }
  func.func @transform_0(%arg0: i32, %arg1: memref<2x2xi32, #tpu.memory_space<smem>>) -> (i32, i32, i32) {
    %c0_i32 = arith.constant 0 : i32
    %c0_i32_0 = arith.constant 0 : i32
    %c0_i32_1 = arith.constant 0 : i32
    return %arg0, %c0_i32, %c0_i32_0 : i32, i32, i32
  }
  func.func @transform_1(%arg0: i32, %arg1: memref<2x2xi32, #tpu.memory_space<smem>>) -> (i32, i32, i32) {
    %c0_i32 = arith.constant 0 : i32
    %c0_i32_0 = arith.constant 0 : i32
    %c0_i32_1 = arith.constant 0 : i32
    return %arg0, %c0_i32, %c0_i32_0 : i32, i32, i32
  }
  func.func @transform_2(%arg0: i32, %arg1: memref<2x2xi32, #tpu.memory_space<smem>>) -> (i32, i32) {
    %c0_i32 = arith.constant 0 : i32
    %c0_i32_0 = arith.constant 0 : i32
    %c0_i32_1 = arith.constant 0 : i32
    return %c0_i32, %c0_i32_0 : i32, i32
  }
  func.func @transform_3(%arg0: i32, %arg1: memref<2x2xi32, #tpu.memory_space<smem>>) -> (i32, i32) {
    %c0_i32 = arith.constant 0 : i32
    %c0_i32_0 = arith.constant 0 : i32
    %c0_i32_1 = arith.constant 0 : i32
    return %c0_i32, %c0_i32_0 : i32, i32
  }
  func.func @transform_4(%arg0: i32, %arg1: memref<2x2xi32, #tpu.memory_space<smem>>) -> (i32, i32) {
    %c0_i32 = arith.constant 0 : i32
    %c0_i32_0 = arith.constant 0 : i32
    %c0_i32_1 = arith.constant 0 : i32
    return %c0_i32, %c0_i32_0 : i32, i32
  }
  func.func @transform_5(%arg0: i32, %arg1: memref<2x2xi32, #tpu.memory_space<smem>>) -> (i32, i32) {
    %c0_i32 = arith.constant 0 : i32
    %c0_i32_0 = arith.constant 0 : i32
    %c0_i32_1 = arith.constant 0 : i32
    return %c0_i32, %c0_i32_0 : i32, i32
  }
  func.func @transform_6(%arg0: i32, %arg1: memref<2x2xi32, #tpu.memory_space<smem>>) -> (i32, i32) {
    %c0_i32 = arith.constant 0 : i32
    %c0_i32_0 = arith.constant 0 : i32
    %c0_i32_1 = arith.constant 0 : i32
    return %c0_i32, %c0_i32_0 : i32, i32
  }
  func.func @transform_7(%arg0: i32, %arg1: memref<2x2xi32, #tpu.memory_space<smem>>) -> (i32, i32) {
    %c0_i32 = arith.constant 0 : i32
    %c0_i32_0 = arith.constant 0 : i32
    %c0_i32_1 = arith.constant 0 : i32
    return %c0_i32, %c0_i32_0 : i32, i32
  }
  func.func @transform_8(%arg0: i32, %arg1: memref<2x2xi32, #tpu.memory_space<smem>>) -> (i32, i32) {
    %c0_i32 = arith.constant 0 : i32
    %c0_i32_0 = arith.constant 0 : i32
    %c0_i32_1 = arith.constant 0 : i32
    return %c0_i32, %c0_i32_0 : i32, i32
  }
  func.func @transform_9(%arg0: i32, %arg1: memref<2x2xi32, #tpu.memory_space<smem>>) -> (i32, i32) {
    %c0_i32 = arith.constant 0 : i32
    %c0_i32_0 = arith.constant 0 : i32
    %c0_i32_1 = arith.constant 0 : i32
    return %c0_i32, %c0_i32_0 : i32, i32
  }
  func.func @transform_10(%arg0: i32, %arg1: memref<2x2xi32, #tpu.memory_space<smem>>) -> (i32, i32) {
    %c0_i32 = arith.constant 0 : i32
    %c0_i32_0 = arith.constant 0 : i32
    %c0_i32_1 = arith.constant 0 : i32
    return %c0_i32, %c0_i32_0 : i32, i32
  }
  func.func @transform_11(%arg0: i32, %arg1: memref<2x2xi32, #tpu.memory_space<smem>>) -> (i32, i32) {
    %c0_i32 = arith.constant 0 : i32
    %c0_i32_0 = arith.constant 0 : i32
    %c0_i32_1 = arith.constant 0 : i32
    return %c0_i32, %c0_i32_0 : i32, i32
  }
  func.func @transform_12(%arg0: i32, %arg1: memref<2x2xi32, #tpu.memory_space<smem>>) -> (i32, i32) {
    %c0_i32 = arith.constant 0 : i32
    %c0_i32_0 = arith.constant 0 : i32
    %c0_i32_1 = arith.constant 0 : i32
    return %c0_i32, %c0_i32_0 : i32, i32
  }
  func.func @transform_13(%arg0: i32, %arg1: memref<2x2xi32, #tpu.memory_space<smem>>) -> (i32, i32) {
    %c0_i32 = arith.constant 0 : i32
    %c0_i32_0 = arith.constant 0 : i32
    %c0_i32_1 = arith.constant 0 : i32
    return %c0_i32, %c0_i32_0 : i32, i32
  }
  func.func @transform_14(%arg0: i32, %arg1: memref<2x2xi32, #tpu.memory_space<smem>>) -> (i32, i32) {
    %c0_i32 = arith.constant 0 : i32
    %c0_i32_0 = arith.constant 0 : i32
    %c0_i32_1 = arith.constant 0 : i32
    return %c0_i32, %c0_i32_0 : i32, i32
  }
  func.func @transform_15(%arg0: i32, %arg1: memref<2x2xi32, #tpu.memory_space<smem>>) -> (i32, i32, i32) {
    %c0_i32 = arith.constant 0 : i32
    %c0_i32_0 = arith.constant 0 : i32
    %c0_i32_1 = arith.constant 0 : i32
    return %arg0, %c0_i32, %c0_i32_0 : i32, i32, i32
  }
}

</mosaic_0001>

<bundles_post_ra>
// kernel: rgat_tuning_forward.1
= control target key start
LH: loop header
LB: loop body
LE: loop exit
PB: predicated region body
PF: predicated region fallthrough
CT: control target
= control target key end

     0   :  { %s2335_s0 = inlined_call_operand.vmem [shape: s32[2,2], index: 0, kind: input, shape index: {}]   ;;  %s2336_s1 = inlined_call_operand.vmem [shape: f32[2,8,32], index: 1, kind: input, shape index: {}]   ;;  %s2337_s2 = inlined_call_operand.vmem [shape: s32[2,16,4], index: 2, kind: input, shape index: {}]   ;;  %s2338_s3 = inlined_call_operand.vmem [shape: f32[10,32], index: 3, kind: input, shape index: {}]   ;;  %s2339_s4 = inlined_call_operand.vmem [shape: f32[32,96], index: 4, kind: input, shape index: {}]   ;;  %s2340_s5 = inlined_call_operand.vmem [shape: f32[1,96], index: 5, kind: input, shape index: {}]   ;;  %s2341_s6 = inlined_call_operand.vmem [shape: f32[32,32], index: 6, kind: input, shape index: {}]   ;;  %s2342_s7 = inlined_call_operand.vmem [shape: f32[1,32], index: 7, kind: input, shape index: {}]   ;;  %s2343_s8 = inlined_call_operand.vmem [shape: f32[1,32], index: 8, kind: input, shape index: {}]   ;;  %s2344_s9 = inlined_call_operand.vmem [shape: f32[1,32], index: 9, kind: input, shape index: {}]   ;;  %s2345_s10 = inlined_call_operand.vmem [shape: f32[32,128], index: 10, kind: input, shape index: {}]   ;;  %s2346_s11 = inlined_call_operand.vmem [shape: f32[1,128], index: 11, kind: input, shape index: {}]   ;;  %s2347_s12 = inlined_call_operand.vmem [shape: f32[128,32], index: 12, kind: input, shape index: {}]   ;;  %s2348_s13 = inlined_call_operand.vmem [shape: f32[1,32], index: 13, kind: input, shape index: {}]   ;;  %s2349_s14 = inlined_call_operand.vmem [shape: f32[1,32], index: 14, kind: input, shape index: {}]   ;;  %s2350_s15 = inlined_call_operand.vmem [shape: f32[1,32], index: 15, kind: input, shape index: {}]   ;;  %s2351_s16 = inlined_call_operand.hbm [shape: f32[2,8,32], index: 16, kind: output, shape index: {}]  }
   0x1   :  { %2357 = sst [smem:[#allocation13_spill]] %s2335_s0 }
   0x2   :  { %2358 = sst [smem:[#allocation14_spill]] %s2344_s9 }
   0x3   :  { %s2359_s23 = sld [smem:[#allocation13_spill]] }
   0x9   :  { %s21_s9 = sshll.u32 %s2359_s23, 4  ;;  %s22_s9 = int_to_ptr.vmem [resolvable:$true] %s21_s9 }
   0xa   :  { %s1869_s24 = scalar_lea.vmem %s22_s9, 32  ;;  %p1874_p1 = scmp.lt.s32.totalorder %s22_s9, %s22_s9 }
   0xb   :  { %p1870_p0 = scmp.ne.s32.totalorder %s22_s9, %s1869_s24  ;;  %p1875_p2 = scmp.lt.s32.totalorder %s1869_s24, %s1869_s24 }
   0xd   :  { %p1876_p3 = por %p1875_p2, %p1874_p1 }
   0xf   :  { %p1877_p4 = pnand %p1876_p3, %p1870_p0 }
  0x11   :  { %1880 = shalt.err (!%p1877_p4)  }
  0x12   :  { %s1945_s25 = smov [#allocation3]  }
  0x13   :  { %24 = dma.vmem_to_smem %s22_s9, 32, %s1945_s25, [#allocation2] }
  0x14   :  { %1923 = dma.done.wait [#allocation2], 32 }
  0x15   :  { %1924 = vsyncadd [#allocation2], 4294967264 }
  0x16   :  { %26 = sfence }
  0x17   :  { %27 = vsyncpa [#allocation5], 0 }
  0x18   :  { %29 = vsyncpa [#allocation5 + $0x1], 0  ;;  %s2042_s26 = smov 0   ;;  %s2044_s27 = smov 0  }
  0x19   :  { %s2046_s28 = smov 0   ;;  %s2048_s29 = smov 0  }
  0x1a LB: > { %2360 = sst [smem:[#allocation8_spill]] %s1931_s26  ;;  %s2063_s9 = sadd.s32 4294967295, %s1943_s29   ;;  %s1943_s29 = sphi %s2048_s29, %s2370_s29   ;;  %s1939_s28 = sphi %s2046_s28, %s2372_s28   ;;  %s1935_s27 = sphi %s2044_s27, %s2374_s27   ;;  %s1931_s26 = sphi %s2042_s26, %s2373_s26  }
  0x1b   : > { %2361 = sst [smem:[#allocation9_spill]] %s1939_s28  ;;  %s1606_s30 = sadd.s32 4294967294, %s1943_s29  }
  0x1c   : > { %s2067_s0 = sadd.s32 1, %s1943_s29   ;;  %s367_s17 = sadd.s32 1, %s1939_s28 }
  0x1d   : > { %2362 = sst [smem:[#allocation10_spill]] %s2067_s0  ;;  %s364_s18 = ssub.s32 %s1943_s29, %s2067_s0 }
  0x1e   : > { %p377_p5 = scmp.ne.s32.totalorder %s1939_s28, %s1935_s27  ;;  %p365_p6 = scmp.eq.s32.totalorder %s364_s18, 0 }
  0x1f   : > { %p378_p7 = scmp.eq.s32.totalorder %s2063_s9, 1  ;;  %p383_p8 = scmp.ne.s32.totalorder %s1935_s27, %s1931_s26 }
  0x20   : > { %p384_p9 = scmp.eq.s32.totalorder %s1606_s30, 1  ;;  %p1609_p12 = scmp.ge.s32.totalorder %s1943_s29, 1 }
  0x21   : > { %s2078_s19 = scalar_select %p365_p6, %s1939_s28, %s367_s17  }
  0x22   : > { %p2080_p10 = por %p378_p7, %p377_p5  ;;  %p2084_p11 = por %p384_p9, %p383_p8 }
  0x23   : > { %2363 = sst [smem:[#allocation11_spill]] %s2078_s19  ;;  %p456_p13 = scmp.lt.s32.totalorder %s1943_s29, 3 }
  0x24   : > { %s2365_s21 = scalar_select %p2084_p11, 1, 0 }
  0x25   : > { %p457_p0 = pnand %p1609_p12, %p456_p13 }
  0x26   : > { %2366 = sst [smem:[#allocation12_spill]] %s2365_s21  ;;  %p508_p1 = scmp.lt.s32.totalorder (!%p457_p0), %s2063_s9, 1 }
  0x27   : > { %460 = sbr.rel (%p457_p0) target bundleno = 2291 (0x8f3), region = 80  ;;  %s1952_s19 = smov (!%p457_p0), 96  }
  0x2c   : > { %v525_v0 = vld [vmem:[%s2339_s4 + $0x18] sm:$0xff]  ;;  %v1946_v1 = vmov 0.0   ;;  %v524_v2 = vld [vmem:[%s2339_s4 + $0x10] sm:$0xff]  ;;  %vm1947_vm0 = vmmov 0   ;;  %s509_s30 = scalar_select %p508_p1, %s2063_s9, 1  ;;  %v1948_v3 = vmov 0   ;;  %v609_v11 = vlaneseq }
  0x2d   : > { %1703 = vmatprep.subr.mxu0 %v1946_v1  ;;  %1711 = vmatprep.mubr.msk.f32.mxu0 %vm1947_vm0, %v1946_v1  ;;  %v523_v4 = vld [vmem:[%s2339_s4 + $0x8] sm:$0xff]  ;;  %v1949_v5 = vmov 1   ;;  %v522_v6 = vld [vmem:[%s2339_s4] sm:$0xff]  ;;  %vm533_vm1 = vcmask 261120   ;;  %v1950_v10 = vmov 2   ;;  %vm647_vm3 = vcmask 64512  }
  0x2e   : > { %1704 = vmatpush3.msra.mxu0 %v525_v0  ;;  %1855 = vset.pattern.permute.xlu1 %v1948_v3  ;;  %s1611_s22 = sshll.u32 %s509_s30, 3  ;;  %s1651_s23 = sshll.u32 %s509_s30, 4  ;;  %v610_v12 = vand.u32 127, %v609_v11  ;;  %v1615_v19 = vld [vmem:[%s2340_s5] ss:$0 sm:$0xff]  ;;  %vm738_vm7 = vcmask 1041408  }
  0x2f   : > { %1705 = vmatprep.subr.mxu0 %v1946_v1  ;;  %1854 = vset.pattern.permute.xlu0 %v1949_v5  ;;  %s511_s0 = scalar_lea.vmem %s2336_s1, %s1611_s22  ;;  %s516_s17 = scalar_lea.vmem %s2337_s2, %s1651_s23  ;;  %v730_v25 = vld [vmem:[%s2338_s3 + $0x8] sm:$0x3]  ;;  %vm731_vm9 = vcmask 80896   ;;  %v729_v27 = vld [vmem:[%s2338_s3] sm:$0xff]  ;;  %v2155_v53 = vshrl.u32 %v609_v11, 7  ;;  %vm1040_vm13 = vcmask 130048  }
  0x30   : > { %1706 = vmatpush3.msra.mxu0 %v524_v2  ;;  %v2115_v7 = vld [vmem:[%s511_s0] sm:$0xff]  ;;  %v608_v9 = vld [vmem:[%s516_s17 + $0x8] sm:$0xff]  ;;  %s1951_s0 = smov 64   ;;  %s2151_s23 = sshll.u32 %s2063_s9, 7  ;;  %v1194_v5 = vld [vmem:[%s2341_s6 + $0x10] sm:$0xff] }
  0x31   : > { %1707 = vmatprep.subr.mxu0 %v1946_v1  ;;  %v607_v8 = vld [vmem:[%s516_s17] sm:$0xff]  ;;  %s519_s24 = sadd.s32 1, %s2151_s23  ;;  %v819_v54 = vadd.s32 8, %v2155_v53  ;;  %s2367_s9 = sld [smem:[#allocation14_spill]] }
  0x32   : > { %1708 = vmatpush3.msra.mxu0 %v523_v4  ;;  %612 = vperm.xlu1 %1855, %v607_v8   ;;  %s520_s25 = sld [smem:[#allocation3 + %s519_s24]]  ;;  %v1195_v4 = vld [vmem:[%s2341_s6 + $0x18] sm:$0xff]  ;;  %s2298_s24 = scalar_lea.hbm %s2351_s16, %s2151_s23 }
  0x33   : > { %1709 = vmatprep.subr.mxu0 %v1946_v1  ;;  %624 = vperm.xlu0 %1854, %v607_v8  }
  0x34   : > { %1710 = vmatpush3.msra.mxu0 %v522_v6  ;;  %v1193_v6 = vld [vmem:[%s2341_s6 + $0x8] sm:$0xff] }
  0x35   : > { %1712 = vmatmul.mubr.msk.f32.vlgmr.msra.gmra.mxu0 %vm533_vm1, %v2115_v7 }
  0x36   : > { %1856 = vset.pattern.permute.xlu1 %v1950_v10 }
  0x37   : > { %636 = vperm.xlu1 %1856, %v607_v8   ;;  %627 = vperm.xlu0 %1854, %v608_v9  }
  0x38   : > { %v820_v56 = vstv %s520_s25  ;;  %s518_s25 = sld [smem:[#allocation3 + %s2151_s23]] }
  0x39   : > { %vm822_vm11 = vcmp.lt.s32.totalorder %v819_v54, %v820_v56  ;;  %vm821_vm12 = vcmp.lt.s32.totalorder %v2155_v53, %v820_v56  ;;  %v1393_v56 = vld [vmem:[%s2347_s12 + $0x8] sm:$0xff] }
  0x3b   : > { %639 = vperm.xlu1 %1856, %v608_v9   ;;  %1857 = vset.pattern.permute.xlu0 %v1948_v3 }
  0x3c   : > { %615 = vperm.xlu0 %1857, %v608_v9  }
  0x3f   : > { %1858 = vset.pattern.permute.xlu1 %v1948_v3 }
  0xad   : > { %v613_v13 = vpop.permute.xlu1 %612 }
  0xae   : > { %vm617_vm2 = vcmp.eq.s32.totalorder %v613_v13, %v610_v12  ;;  %v625_v14 = vpop.permute.xlu0 %624  ;;  %v1192_v13 = vld [vmem:[%s2341_s6] sm:$0xff] }
  0xaf   : > { %vm629_vm4 = vcmp.eq.s32.totalorder %v625_v14, %v610_v12  ;;  %v1617_v15 = vsel %vm617_vm2, 1.0, %v1946_v1 }
  0xb0   : > { %v1619_v16 = vsel %vm629_vm4, 1.0, %v1946_v1  ;;  %1728 = vmatprep.mubr.msk.f32.mxu1 %vm647_vm3, %v1617_v15 }
  0xb1   : > { %1716 = vmatprep.mubr.msk.f32.mxu0 %vm647_vm3, %v1619_v16 }
  0xb2   : > { %v637_v17 = vpop.permute.xlu1 %636  ;;  %v628_v18 = vpop.permute.xlu0 %627 }
  0xb3   : > { %vm630_vm5 = vcmp.eq.s32.totalorder %v628_v18, %v610_v12  ;;  %vm641_vm6 = vcmp.eq.s32.totalorder %v637_v17, %v610_v12  ;;  %v1638_v17 = vld [vmem:[%s2342_s7] ss:$0 sm:$0xff] }
  0xb4   : > { %v1620_v24 = vsel %vm630_vm5, 1.0, %v1946_v1  ;;  %v1621_v26 = vsel %vm641_vm6, 1.0, %v1946_v1 }
  0xb6   : > { %v640_v22 = vpop.permute.xlu1 %639 }
  0xb7   : > { %vm642_vm8 = vcmp.eq.s32.totalorder %v640_v22, %v610_v12  ;;  %v616_v29 = vpop.permute.xlu0 %615 }
  0xb8   : > { %v1622_v28 = vsel %vm642_vm8, 1.0, %v1946_v1  ;;  %vm618_vm10 = vcmp.eq.s32.totalorder %v616_v29, %v610_v12  ;;  %v1309_v29 = vld [vmem:[%s2345_s10 + $0x10] sm:$0xff] }
  0xb9   : > { %v1618_v30 = vsel %vm618_vm10, 1.0, %v1946_v1 }
  0xf5   : > { %v603_v20 = vpop.f32.mrf.mxu0 }
  0xf6   : > { %v604_v21 = vadd.f32 %v1615_v19, %v603_v20 }
  0xf7   : > { %v1713_v23 = vpop.f32.mrf.mxu0 }
  0xf8   : > { %928 = vrot.lane.b32.xlu0 %v604_v21, %s1951_s0  ;;  %824 = vrot.lane.b32.xlu1 %v604_v21, %s1952_s19 }
  0xf9   : > { %1714 = vmatprep.subr.mxu0 %v604_v21 }
  0xfa   : > { %1715 = vmatpush3.msra.mxu0 %v604_v21 }
  0xfb   : > { %1717 = vmatmul.mubr.msk.f32.vlgmr.msra.gmra.mxu0 %vm647_vm3, %v1620_v24  ;;  %1719 = vmatprep.subr.msk.mxu0 %vm738_vm7, %v730_v25 }
  0xfc   : > { %1720 = vmatpush3.msk.msra.mxu0 %vm738_vm7, %v730_v25  ;;  %1723 = vmatprep.mubr.msk.f32.mxu0 %vm731_vm9, %v1621_v26 }
  0xfd   : > { %1721 = vmatprep.subr.mxu0 %v729_v27 }
  0xfe   : > { %1722 = vmatpush3.msra.mxu0 %v729_v27 }
  0xff   : > { %1724 = vmatmul.mubr.msk.f32.vlgmr.msra.gmra.mxu0 %vm731_vm9, %v1622_v28  ;;  %v1310_v28 = vld [vmem:[%s2345_s10 + $0x18] sm:$0xff] }
 0x100   : > { %1733 = vmatprep.mubr.msk.f32.mxu0 %vm647_vm3, %v1617_v15 }
 0x16a   : > { %v929_v31 = vpop.permute.xlu0 %928  ;;  %v825_v32 = vpop.permute.xlu1 %824 }
 0x16b   : > { %1726 = vmatprep.subr.mxu1 %v825_v32  ;;  %1731 = vmatprep.subr.mxu0 %v929_v31 }
 0x16c   : > { %1727 = vmatpush3.msra.mxu1 %v825_v32  ;;  %1732 = vmatpush3.msra.mxu0 %v929_v31  ;;  %v1307_v31 = vld [vmem:[%s2345_s10] sm:$0xff]  ;;  %v1407_v32 = vld [vmem:[%s2347_s12 + $0x78] sm:$0xff] }
 0x16d   : > { %1729 = vmatmul.mubr.msk.f32.vlgmr.msra.gmra.mxu1 %vm647_vm3, %v1618_v30  ;;  %1734 = vmatmul.mubr.msk.f32.vlgmr.msra.gmra.mxu0 %vm647_vm3, %v1618_v30  ;;  %v1308_v30 = vld [vmem:[%s2345_s10 + $0x8] sm:$0xff] }
 0x16e   : > { %1743 = vmatprep.subr.mxu0 %v1946_v1  ;;  %1736 = vmatprep.subr.mxu1 %v1946_v1 }
 0x16f   : > { %1740 = vmatprep.mubr.msk.f32.mxu1 %vm1947_vm0, %v1946_v1  ;;  %1747 = vmatprep.mubr.msk.f32.mxu0 %vm1947_vm0, %v1946_v1 }
 0x1bb   : > { %v1718_v33 = vpop.f32.mrf.mxu0 }
 0x1bd   : > { %v720_v34 = vpop.f32.mrf.mxu0 }
 0x1bf   : > { %v1725_v35 = vpop.f32.mrf.mxu0 }
 0x1c1   : > { %v808_v38 = vpop.f32.mrf.mxu0 }
 0x22d   : > { %v1730_v36 = vpop.f32.mrf.mxu1  ;;  %v1735_v55 = vpop.f32.mrf.mxu0 }
 0x22e   : > { %v905_v37 = vadd.f32 %v1730_v36, %v1725_v35  ;;  %v1003_v59 = vadd.f32 %v1735_v55, %v1725_v35  ;;  %v1404_v35 = vld [vmem:[%s2347_s12 + $0x60] sm:$0xff]  ;;  %v1403_v36 = vld [vmem:[%s2347_s12 + $0x58] sm:$0xff]  ;;  %v1394_v55 = vld [vmem:[%s2347_s12 + $0x10] sm:$0xff] }
 0x22f   : > { %v899_v39 = vpop.f32.mrf.mxu1  ;;  %v997_v57 = vpop.f32.mrf.mxu0 }
 0x230   : > { %v900_v40 = vadd.f32 %v899_v39, %v808_v38  ;;  %v909_v41 = vmul.f32 %v1718_v33, %v905_v37  ;;  %v998_v62 = vadd.f32 %v997_v57, %v808_v38  ;;  %v1406_v33 = vld [vmem:[%s2347_s12 + $0x70] sm:$0xff]  ;;  %v1401_v38 = vld [vmem:[%s2347_s12 + $0x48] sm:$0xff]  ;;  %v1400_v39 = vld [vmem:[%s2347_s12 + $0x40] sm:$0xff] }
 0x231   : > { %v1402_v37 = vld [vmem:[%s2347_s12 + $0x50] sm:$0xff]  ;;  %v1392_v57 = vld [vmem:[%s2347_s12] sm:$0xff] }
 0x232   : > { %v913_v42 = vsel %vm533_vm1, %v909_v41, 0.0  ;;  %v908_v43 = vmul.f32 %v900_v40, %v720_v34  ;;  %v1405_v34 = vld [vmem:[%s2347_s12 + $0x68] sm:$0xff]  ;;  %v1399_v40 = vld [vmem:[%s2347_s12 + $0x38] sm:$0xff]  ;;  %v1398_v41 = vld [vmem:[%s2347_s12 + $0x30] sm:$0xff] }
 0x233   : > { %914 = vadd.xlane.f32.xlu1 %v913_v42  ;;  %v1397_v42 = vld [vmem:[%s2347_s12 + $0x28] sm:$0xff] }
 0x234   : > { %v910_v44 = vsel %vm533_vm1, %v908_v43, 0.0  ;;  %v1396_v43 = vld [vmem:[%s2347_s12 + $0x20] sm:$0xff] }
 0x235   : > { %911 = vadd.xlane.f32.xlu0 %v910_v44  ;;  %v1395_v44 = vld [vmem:[%s2347_s12 + $0x18] sm:$0xff] }
 0x262   : > { %1008 = vxpose.xlu0.b32.start [1/2] (short) (narrow) %v1619_v16, 8 }
 0x266   : > { %1009 = vxpose.xlu0.b32.end [2/2] (short) (narrow) %v1620_v24, 8 }
 0x2bc   : > { %v915_v45 = vpop.xlane.xlu1 %914 }
 0x2bd   : > { %v917_v46 = vmul.f32 0.17677669, %v915_v45 }
 0x2be   : > { %v912_v47 = vpop.xlane.xlu0 %911 }
 0x2bf   : > { %v1631_v48 = vclamps-f32 %v917_v46, 10.0  ;;  %v916_v49 = vmul.f32 0.17677669, %v912_v47 }
 0x2c1   : > { %v924_v50 = vmul.f32 1.442695, %v1631_v48  ;;  %v1630_v51 = vclamps-f32 %v916_v49, 10.0  ;;  %v1640_v49 = vld [vmem:[%s2343_s8] ss:$0 sm:$0xff] }
 0x2c3   : > { %1859 = vpow2.f32 %v924_v50  ;;  %v922_v52 = vmul.f32 1.442695, %v1630_v51  ;;  %v1641_v51 = vld [vmem:[%s2367_s9] ss:$0 sm:$0xff]  ;;  %s505_s9 = sand.u32 1, %s1935_s27  }
 0x2c4   : > { %s1610_s17 = sshll.u32 %s505_s9, 3 }
 0x2c5   : > { %1861 = vpow2.f32 %v922_v52  ;;  %s507_s21 = scalar_lea.vmem [#allocation4], %s1610_s17  ;;  %s1953_s17 = smov [#allocation4]  }
 0x2c6   : > { %s1535_s30 = sshll.u32 %s507_s21, 4  ;;  %s1885_s28 = sshll.u32 %s1953_s17, 4  ;;  %s1536_s30 = int_to_ptr.vmem [resolvable:$true] %s1535_s30  ;;  %s1886_s28 = int_to_ptr.vmem [resolvable:$false] %s1885_s28 }
 0x2c7   : > { %s1881_s26 = scalar_lea.vmem %s1536_s30, 128  ;;  %s1887_s0 = scalar_lea.vmem %s1886_s28, 256 }
 0x2c8   : > { %p1882_p2 = scmp.ne.s32.totalorder %s1536_s30, %s1881_s26  ;;  %p1888_p5 = scmp.lt.s32.totalorder %s1536_s30, %s1886_s28 }
 0x2c9   : > { %p1889_p6 = scmp.lt.s32.totalorder %s1887_s0, %s1881_s26 }
 0x2ca   : > { %p1883_p3 = pnand %p1882_p2, %p2080_p10 }
 0x2cb   : > { %p1890_p7 = por %p1889_p6, %p1888_p5 }
 0x2cc   : > { %p1884_p4 = pneg %p1883_p3 }
 0x2ce   : > { %p1891_p8 = pnand %p1890_p7, %p1884_p4 }
 0x2d0   : > { %v1860_v58 = vpop.eup %1859 }
 0x2d1   : > { %v927_v60 = vsel %vm822_vm11, %v1860_v58, 0.0  ;;  %1744 = vmatpush3.msk.msra.mxu0 %vm822_vm11, %v1860_v58  ;;  %v1642_v58 = vld [vmem:[%s2346_s11] ss:$0 sm:$0xff] }
 0x2d2   : > { %v1862_v61 = vpop.eup %1861  ;;  %1745 = vmatprep.subr.mxu0 %v1946_v1  ;;  %v1007_v63 = vmul.f32 %v1003_v59, %v927_v60 }
 0x2d3   : > { %v926_v0 = vsel %vm821_vm12, %v1862_v61, 0.0  ;;  %1746 = vmatpush3.msk.msra.mxu0 %vm821_vm12, %v1862_v61 }
 0x2d4   : > { %1737 = vmatpush3.msra.mxu1 %v1007_v63  ;;  %v1006_v2 = vmul.f32 %v998_v62, %v926_v0  ;;  %1750 = vmatprep.subr.mxu0 %v1946_v1  ;;  %v1644_v63 = vld [vmem:[%s2348_s13] ss:$0 sm:$0xff] }
 0x2d5   : > { %1738 = vmatprep.subr.mxu1 %v1946_v1 }
 0x2d6   : > { %1739 = vmatpush3.msra.mxu1 %v1006_v2 }
 0x2d7   : > { %1772 = vmatprep.subr.mxu1 %v1946_v1 }
 0x2de   : > { %v1024_v3 = vpop.trf.xlu0 }
 0x2df   : > { %1741 = vmatmul.mubr.msk.f32.vlgmr.msra.gmra.mxu1 %vm1040_vm13, %v1024_v3  ;;  %1748 = vmatmul.mubr.msk.f32.vlgmr.msra.gmra.mxu0 %vm1040_vm13, %v1024_v3 }
 0x2e0   : > { %1758 = vmatprep.mubr.msk.f32.mxu0 %vm1947_vm0, %v1946_v1  ;;  %1804 = vmatprep.mubr.msk.f32.mxu1 %vm1947_vm0, %v1946_v1 }
 0x2e1   : > { %1751 = vmatpush3.msra.mxu0 %v1195_v4  ;;  %1773 = vmatpush3.msra.mxu1 %v1407_v32 }
 0x2e2   : > { %1752 = vmatprep.subr.mxu0 %v1946_v1  ;;  %1774 = vmatprep.subr.mxu1 %v1946_v1 }
 0x2e3   : > { %1753 = vmatpush3.msra.mxu0 %v1194_v5  ;;  %1775 = vmatpush3.msra.mxu1 %v1406_v33 }
 0x2e4   : > { %1754 = vmatprep.subr.mxu0 %v1946_v1  ;;  %1776 = vmatprep.subr.mxu1 %v1946_v1 }
 0x2e5   : > { %1755 = vmatpush3.msra.mxu0 %v1193_v6  ;;  %1777 = vmatpush3.msra.mxu1 %v1405_v34 }
 0x2e6   : > { %1756 = vmatprep.subr.mxu0 %v1946_v1  ;;  %1778 = vmatprep.subr.mxu1 %v1946_v1 }
 0x2e7   : > { %1757 = vmatpush3.msra.mxu0 %v1192_v13  ;;  %1779 = vmatpush3.msra.mxu1 %v1404_v35 }
 0x2e8   : > { %1761 = vmatprep.subr.mxu0 %v1946_v1  ;;  %1780 = vmatprep.subr.mxu1 %v1946_v1 }
 0x2e9   : > { %1781 = vmatpush3.msra.mxu1 %v1403_v36 }
 0x2ea   : > { %1782 = vmatprep.subr.mxu1 %v1946_v1 }
 0x2eb   : > { %1783 = vmatpush3.msra.mxu1 %v1402_v37 }
 0x2ec   : > { %1784 = vmatprep.subr.mxu1 %v1946_v1 }
 0x2ed   : > { %1785 = vmatpush3.msra.mxu1 %v1401_v38 }
 0x2ee   : > { %1786 = vmatprep.subr.mxu1 %v1946_v1 }
 0x2ef   : > { %1787 = vmatpush3.msra.mxu1 %v1400_v39 }
 0x2f0   : > { %1788 = vmatprep.subr.mxu1 %v1946_v1 }
 0x2f1   : > { %1789 = vmatpush3.msra.mxu1 %v1399_v40 }
 0x2f2   : > { %1790 = vmatprep.subr.mxu1 %v1946_v1 }
 0x2f3   : > { %1791 = vmatpush3.msra.mxu1 %v1398_v41 }
 0x2f4   : > { %1792 = vmatprep.subr.mxu1 %v1946_v1 }
 0x2f5   : > { %1793 = vmatpush3.msra.mxu1 %v1397_v42 }
 0x2f6   : > { %1794 = vmatprep.subr.mxu1 %v1946_v1 }
 0x2f7   : > { %1795 = vmatpush3.msra.mxu1 %v1396_v43 }
 0x2f8   : > { %1796 = vmatprep.subr.mxu1 %v1946_v1 }
 0x2f9   : > { %1797 = vmatpush3.msra.mxu1 %v1395_v44 }
 0x2fa   : > { %1798 = vmatprep.subr.mxu1 %v1946_v1 }
 0x2fb   : > { %1799 = vmatpush3.msra.mxu1 %v1394_v55 }
 0x2fc   : > { %1800 = vmatprep.subr.mxu1 %v1946_v1 }
 0x2fd   : > { %1801 = vmatpush3.msra.mxu1 %v1393_v56 }
 0x2fe   : > { %1802 = vmatprep.subr.mxu1 %v1946_v1 }
 0x2ff   : > { %1803 = vmatpush3.msra.mxu1 %v1392_v57 }
 0x39f   : > { %v1110_v8 = vpop.f32.mrf.mxu1  ;;  %v1180_v9 = vpop.f32.mrf.mxu0 }
 0x3a0   : > { %v1184_v10 = vmax.f32 %v1180_v9, 1e-06 }
 0x3a1   : > { %v1742_v11 = vpop.f32.mrf.mxu1  ;;  %v1749_v12 = vpop.f32.mrf.mxu0 }
 0x3a2   : > { %1863 = vrcp.f32 %v1184_v10 }
 0x3af   : > { %v1864_v14 = vpop.eup %1863 }
 0x3b0   : > { %1188 = vperm.xlu1 %1858, %v1864_v14  }
 0x42b   : > { %v1189_v15 = vpop.permute.xlu1 %1188 }
 0x42c   : > { %v1191_v16 = vmul.f32 %v1189_v15, %v1110_v8  ;;  %v1645_v15 = vld [vmem:[%s2349_s14] ss:$0 sm:$0xff] }
 0x42e   : > { %1759 = vmatmul.mubr.msk.f32.vlgmr.msra.gmra.mxu0 %vm533_vm1, %v1191_v16 }
 0x42f   : > { %1769 = vmatprep.mubr.msk.f32.mxu0 %vm1947_vm0, %v1946_v1  ;;  %1762 = vmatpush3.msra.mxu0 %v1310_v28 }
 0x430   : > { %1763 = vmatprep.subr.mxu0 %v1946_v1 }
 0x431   : > { %1764 = vmatpush3.msra.mxu0 %v1309_v29 }
 0x432   : > { %1765 = vmatprep.subr.mxu0 %v1946_v1 }
 0x433   : > { %1766 = vmatpush3.msra.mxu0 %v1308_v30 }
 0x434   : > { %1767 = vmatprep.subr.mxu0 %v1946_v1 }
 0x435   : > { %1768 = vmatpush3.msra.mxu0 %v1307_v31 }
 0x4ee   : > { %v1272_v18 = vpop.f32.mrf.mxu0 }
 0x4ef   : > { %v1273_v19 = vadd.f32 %v1638_v17, %v1272_v18  ;;  %v1515_v17 = vstv %s518_s25  ;;  %v1646_v18 = vld [vmem:[%s2350_s15] ss:$0 sm:$0xff]  ;;  %s1522_s25 = scalar_lea.sflag [#allocation5], %s505_s9 }
 0x4f0   : > { %v1760_v20 = vpop.f32.mrf.mxu0  ;;  %vm1516_vm14 = vcmp.lt.s32.totalorder %v2155_v53, %v1515_v17 }
 0x4f1   : > { %v1276_v21 = vadd.f32 %v1273_v19, %v2115_v7 }
 0x4f3   : > { %v1279_v22 = vsel %vm533_vm1, %v1276_v21, 0.0 }
 0x4f4   : > { %1280 = vadd.xlane.f32.xlu1 %v1279_v22 }
 0x57d   : > { %v1281_v23 = vpop.xlane.xlu1 %1280 }
 0x57e   : > { %v1283_v24 = vmul.f32 0.03125, %v1281_v23 }
 0x580   : > { %v1284_v25 = vsub.f32 %v1276_v21, %v1283_v24 }
 0x582   : > { %v1285_v26 = vmul.f32 %v1284_v25, %v1284_v25 }
 0x584   : > { %v1286_v27 = vsel %vm533_vm1, %v1285_v26, 0.0 }
 0x585   : > { %1287 = vadd.xlane.f32.xlu0 %v1286_v27 }
 0x60e   : > { %v1288_v45 = vpop.xlane.xlu0 %1287 }
 0x60f   : > { %v1289_v46 = vmul.f32 0.03125, %v1288_v45 }
 0x611   : > { %v1290_v47 = vadd.f32 1e-05, %v1289_v46 }
 0x613   : > { %1865 = vrsqrt.f32 %v1290_v47 }
 0x620   : > { %v1866_v48 = vpop.eup %1865 }
 0x621   : > { %v1292_v50 = vmul.f32 %v1866_v48, %v1284_v25 }
 0x623   : > { %v1299_v52 = vmul.f32 %v1640_v49, %v1292_v50 }
 0x625   : > { %v1306_v54 = vadd.f32 %v1641_v51, %v1299_v52 }
 0x627   : > { %1770 = vmatmul.mubr.msk.f32.vlgmr.msra.gmra.mxu0 %vm533_vm1, %v1306_v54 }
 0x6e7   : > { %v1387_v59 = vpop.f32.mrf.mxu0 }
 0x6e8   : > { %v1388_v60 = vadd.f32 %v1642_v58, %v1387_v59 }
 0x6e9   : > { %v1771_v61 = vpop.f32.mrf.mxu0 }
 0x6ea   : > { %v1391_v62 = vmax.f32 %v1388_v60, 0.0 }
 0x6ec   : > { %1805 = vmatmul.mubr.f32.vlgmr.msra.gmra.mxu1 %v1391_v62 }
 0x7ac   : > { %v1481_v0 = vpop.f32.mrf.mxu1 }
 0x7ad   : > { %v1482_v2 = vadd.f32 %v1644_v63, %v1481_v0 }
 0x7ae   : > { %v1806_v3 = vpop.f32.mrf.mxu1 }
 0x7af   : > { %v1485_v1 = vadd.f32 %v1482_v2, %v1306_v54 }
 0x7b1   : > { %v1488_v4 = vsel %vm533_vm1, %v1485_v1, 0.0 }
 0x7b2   : > { %1489 = vadd.xlane.f32.xlu1 %v1488_v4 }
 0x83b   : > { %v1490_v5 = vpop.xlane.xlu1 %1489 }
 0x83c   : > { %v1491_v6 = vmul.f32 0.03125, %v1490_v5 }
 0x83e   : > { %v1492_v8 = vsub.f32 %v1485_v1, %v1491_v6 }
 0x840   : > { %v1493_v9 = vmul.f32 %v1492_v8, %v1492_v8 }
 0x842   : > { %v1494_v10 = vsel %vm533_vm1, %v1493_v9, 0.0 }
 0x843   : > { %1495 = vadd.xlane.f32.xlu1 %v1494_v10 }
 0x8cc   : > { %v1496_v11 = vpop.xlane.xlu1 %1495 }
 0x8cd   : > { %v1497_v12 = vmul.f32 0.03125, %v1496_v11 }
 0x8cf   : > { %v1498_v13 = vadd.f32 1e-05, %v1497_v12 }
 0x8d1   : > { %1867 = vrsqrt.f32 %v1498_v13 }
 0x8de   : > { %v1868_v14 = vpop.eup %1867 }
 0x8df   : > { %v1500_v16 = vmul.f32 %v1868_v14, %v1492_v8 }
 0x8e1   : > { %v1507_v19 = vmul.f32 %v1645_v15, %v1500_v16 }
 0x8e3   : > { %v1514_v20 = vadd.f32 %v1646_v18, %v1507_v19 }
 0x8e5   : > { %v1519_v21 = vsel %vm1516_vm14, %v1514_v20, %v2115_v7 }
 0x8e6   : > { %1520 = vst.msk [vmem:[%s507_s21] sm:$0xff] %vm533_vm1, %v1519_v21 }
 0x8e7   : > { %1894 = shalt.err (!%p1891_p8)
}
 0x8e8   : > { %s1895_s23 = scalar_lea.hbm %s2298_s24, 128  ;;  %s1899_s21 = scalar_lea.hbm %s2351_s16, 256 }
 0x8e9   : > { %p1896_p9 = scmp.ne.s32.totalorder %s2298_s24, %s1895_s23  ;;  %p1900_p0 = scmp.lt.s32.totalorder %s2298_s24, %s2351_s16 }
 0x8ea   : > { %p1901_p1 = scmp.lt.s32.totalorder %s1899_s21, %s1895_s23 }
 0x8eb   : > { %p1897_p12 = pnand %p1896_p9, %p2080_p10 }
 0x8ec   : > { %p1902_p2 = por %p1901_p1, %p1900_p0 }
 0x8ed   : > { %p1898_p13 = pneg %p1897_p12 }
 0x8ef   : > { %p1903_p3 = pnand %p1902_p2, %p1898_p13 }
 0x8f1   : > { %1906 = shalt.err (!%p1903_p3)
}
 0x8f2   : > { %1807 = dma.vmem_to_hbm [thread:$0]  (%p2080_p10), %s1536_s30, 128, %s2298_s24, %s1522_s25  }
 0x8f3 PF: > { %s2368_s26 = sld [smem:[#allocation8_spill]]  ;;  %p1813_p4 = scmp.ge.s32.totalorder %s1943_s29, 2 }
 0x8f5   : > { %p1810_p5 = pnand %p1813_p4, %p2084_p11 }
 0x8f7   : > { %p1811_p6 = pneg %p1810_p5 }
 0x8f9   : > { %s1547_s28 = sand.u32 1, %s2368_s26  }
 0x8fa   : > { %s1548_s0 = scalar_lea.sflag [#allocation5], %s1547_s28 }
 0x8fb   : > { %1926 = dma.done.wait (%p1811_p6), %s1548_s0, 128  }
 0x8fc   : > { %1928 = vsyncadd (%p1811_p6), %s1548_s0, 4294967168  ;;  %s2370_s29 = sld [smem:[#allocation10_spill]]  ;;  %s2373_s26 = smov %s1935_s27 }
 0x8fd   : > { %s2371_s23 = sld [smem:[#allocation9_spill]] }
 0x8fe   : > { %s2372_s28 = sld [smem:[#allocation11_spill]] }
 0x902   : > { %p32_p7 = scmp.ge.s32.totalorder %s2370_s29, 4  }
 0x903   : > { %s2374_s27 = smov %s2371_s23 }
 0x904   :  { %34 = sbr.rel (!%p32_p7) target bundleno = 26 (0x1a), region = 118 }
 0x909   :  { %1553 = vsyncpa [#allocation5], 1 }
 0x90a   :  { %1555 = vsyncpa [#allocation5 + $0x1], 1 }

</bundles_post_ra>
